<compile_context>
chip_gen: v6e
topology: v6e:2x2x1
jax: 0.10.0
libtpu: 0.0.40
codegen_flags: <defaults>
</compile_context>

<pallas_src>
import functools

import numpy as np
import jax
import jax.numpy as jnp
from jax import lax
from jax.experimental import pallas as pl
from jax.experimental.pallas import tpu as pltpu


# ---------------------------------------------------------------------------
# Generation-aware limits (v5e/v6e: 128 MiB VMEM, v7x: 64 MiB per TensorCore).
# ---------------------------------------------------------------------------
@functools.lru_cache(maxsize=1)
def _tpu_config():
    vmem_cap = None
    try:
        vmem_cap = int(pltpu.get_tpu_info().vmem_capacity_bytes)
    except Exception:
        vmem_cap = None
    if vmem_cap is not None and vmem_cap >= 100 * 1024 * 1024:
        # v5e / v6e: plenty of VMEM -> bigger tiles, deeper scoped limit.
        return {"tf_cap": 131072,                       # 4 MiB f32 tiles
                "vmem_limit": 64 * 1024 * 1024,
                "single_pass_max": 32 * 1024 * 1024}
    # v7x (64 MiB VMEM) or unknown backend: conservative, safe everywhere.
    return {"tf_cap": 65536,                            # 2 MiB f32 tiles
            "vmem_limit": 32 * 1024 * 1024,
            "single_pass_max": 16 * 1024 * 1024}


# ---------------------------------------------------------------------------
# Flatten to a lane-dense (8, Ftot) slab.  Padding uses edge replication so
# hardswish(pad) equals hardswish of a real element -> global min/max (and
# hence act_range / qparams) stay exact; padded outputs are sliced away.
# ---------------------------------------------------------------------------
def _prep(x, tf_cap):
    n = x.size
    tf = 128
    # Grow TF while keeping >= ~8 lane blocks (bounds pad waste + keeps a
    # useful serial axis) and the tile under the generation-specific cap.
    while tf * 2 <= tf_cap and (tf * 2) * 64 <= n:
        tf *= 2
    lanes_needed = -(-n // 8)
    nb = max(1, -(-lanes_needed // tf))
    ftot = nb * tf
    flat = x.reshape(-1)
    pad = 8 * ftot - n
    if pad:
        flat = jnp.pad(flat, (0, pad), mode="edge")
    return flat.reshape(8, ftot), tf, nb


def _hswish6(xf):
    # 6 * hardswish(x) = x * relu6(x + 3); the 1/6 is folded into scalars.
    return xf * jnp.clip(xf + 3.0, 0.0, 6.0)


# ---------------------------------------------------------------------------
# Kernel: plain hardswish (eval path), 1D parallel grid over lane blocks.
# ---------------------------------------------------------------------------
def _hswish_kernel(x_ref, o_ref):
    xf = x_ref[...].astype(jnp.float32)
    o_ref[...] = (_hswish6(xf) * (1.0 / 6.0)).astype(o_ref.dtype)


def hswish_only(x2d, *, tf, nb, vmem_limit):
    m8, ftot = x2d.shape
    return pl.pallas_call(
        _hswish_kernel,
        out_shape=jax.ShapeDtypeStruct((m8, ftot), x2d.dtype),
        grid=(nb,),
        in_specs=[pl.BlockSpec((8, tf), lambda j: (0, j))],
        out_specs=pl.BlockSpec((8, tf), lambda j: (0, j)),
        compiler_params=pltpu.CompilerParams(
            dimension_semantics=("parallel",),
            vmem_limit_bytes=vmem_limit),
    )(x2d)


# ---------------------------------------------------------------------------
# Kernel: hardswish min/max only (pass 1 of the large fake-quant path).
# Grid (npar, nser): "parallel" leading axis (megacore on v7x), reduction last.
# Elementwise (8, TF) accumulators; single cross-lane reduce at the last step.
# ---------------------------------------------------------------------------
def _hswish_minmax_kernel(x_ref, mn_ref, mx_ref, mn_sc, mx_sc):
    j = pl.program_id(1)
    nj = pl.num_programs(1)
    y6 = _hswish6(x_ref[...].astype(jnp.float32))

    @pl.when(j == 0)
    def _():
        mn_sc[...] = y6
        mx_sc[...] = y6

    @pl.when(j > 0)
    def _():
        mn_sc[...] = jnp.minimum(mn_sc[...], y6)
        mx_sc[...] = jnp.maximum(mx_sc[...], y6)

    @pl.when(j == nj - 1)
    def _():
        mn_ref[0] = jnp.broadcast_to(jnp.min(mn_sc[...], keepdims=True), (8, 128))
        mx_ref[0] = jnp.broadcast_to(jnp.max(mx_sc[...], keepdims=True), (8, 128))


def hswish_minmax(x2d, *, tf, nb, vmem_limit):
    _, ftot = x2d.shape
    npar = 2 if (nb % 2 == 0 and nb >= 8) else 1
    nser = nb // npar
    return pl.pallas_call(
        _hswish_minmax_kernel,
        out_shape=(jax.ShapeDtypeStruct((npar, 8, 128), jnp.float32),
                   jax.ShapeDtypeStruct((npar, 8, 128), jnp.float32)),
        grid=(npar, nser),
        in_specs=[pl.BlockSpec((8, tf), lambda i, j: (0, i * nser + j))],
        out_specs=(pl.BlockSpec((1, 8, 128), lambda i, j: (i, 0, 0)),
                   pl.BlockSpec((1, 8, 128), lambda i, j: (i, 0, 0))),
        scratch_shapes=[pltpu.VMEM((8, tf), jnp.float32),
                        pltpu.VMEM((8, tf), jnp.float32)],
        compiler_params=pltpu.CompilerParams(
            dimension_semantics=("parallel", "arbitrary"),
            vmem_limit_bytes=vmem_limit),
    )(x2d)


# ---------------------------------------------------------------------------
# Kernel: hardswish output + min/max (training paths without fake quant).
# ---------------------------------------------------------------------------
def _hswish_out_minmax_kernel(x_ref, y_ref, mn_ref, mx_ref, mn_sc, mx_sc):
    j = pl.program_id(1)
    nj = pl.num_programs(1)
    y6 = _hswish6(x_ref[...].astype(jnp.float32))
    y_ref[...] = (y6 * (1.0 / 6.0)).astype(y_ref.dtype)

    @pl.when(j == 0)
    def _():
        mn_sc[...] = y6
        mx_sc[...] = y6

    @pl.when(j > 0)
    def _():
        mn_sc[...] = jnp.minimum(mn_sc[...], y6)
        mx_sc[...] = jnp.maximum(mx_sc[...], y6)

    @pl.when(j == nj - 1)
    def _():
        mn_ref[0] = jnp.broadcast_to(jnp.min(mn_sc[...], keepdims=True), (8, 128))
        mx_ref[0] = jnp.broadcast_to(jnp.max(mx_sc[...], keepdims=True), (8, 128))


def hswish_with_range(x2d, *, tf, nb, vmem_limit):
    m8, ftot = x2d.shape
    npar = 2 if (nb % 2 == 0 and nb >= 8) else 1
    nser = nb // npar
    return pl.pallas_call(
        _hswish_out_minmax_kernel,
        out_shape=(jax.ShapeDtypeStruct((m8, ftot), x2d.dtype),
                   jax.ShapeDtypeStruct((npar, 8, 128), jnp.float32),
                   jax.ShapeDtypeStruct((npar, 8, 128), jnp.float32)),
        grid=(npar, nser),
        in_specs=[pl.BlockSpec((8, tf), lambda i, j: (0, i * nser + j))],
        out_specs=(pl.BlockSpec((8, tf), lambda i, j: (0, i * nser + j)),
                   pl.BlockSpec((1, 8, 128), lambda i, j: (i, 0, 0)),
                   pl.BlockSpec((1, 8, 128), lambda i, j: (i, 0, 0))),
        scratch_shapes=[pltpu.VMEM((8, tf), jnp.float32),
                        pltpu.VMEM((8, tf), jnp.float32)],
        compiler_params=pltpu.CompilerParams(
            dimension_semantics=("parallel", "arbitrary"),
            vmem_limit_bytes=vmem_limit),
    )(x2d)


# ---------------------------------------------------------------------------
# Kernel: recompute hardswish + fake quant (pass 2 of the large FQ path).
# qparams = (s, 1/(6s), z) in SMEM: the hardswish 1/6 is folded into the scale.
# ---------------------------------------------------------------------------
def _hswish_fq_kernel(qp_ref, x_ref, o_ref, *, q_max):
    xf = x_ref[...].astype(jnp.float32)
    y6 = _hswish6(xf)
    s = qp_ref[0]
    inv_6s = qp_ref[1]
    z = qp_ref[2]
    # NOTE: round-then-clip, matching torch.clamp(torch.round(x/s + z), 0, q_max).
    q = jnp.clip(jnp.round(y6 * inv_6s + z), 0.0, float(q_max))
    o_ref[...] = ((q - z) * s).astype(o_ref.dtype)


def hswish_fake_quant(x2d, qparams, *, q_max, tf, nb, vmem_limit):
    m8, ftot = x2d.shape
    kern = functools.partial(_hswish_fq_kernel, q_max=q_max)
    return pl.pallas_call(
        kern,
        out_shape=jax.ShapeDtypeStruct((m8, ftot), x2d.dtype),
        grid=(nb,),
        in_specs=[pl.BlockSpec(memory_space=pltpu.MemorySpace.SMEM),   # (3,) qparams
                  pl.BlockSpec((8, tf), lambda j: (0, j))],
        out_specs=pl.BlockSpec((8, tf), lambda j: (0, j)),
        compiler_params=pltpu.CompilerParams(
            dimension_semantics=("parallel",),
            vmem_limit_bytes=vmem_limit),
    )(qparams, x2d)


# ---------------------------------------------------------------------------
# Kernel: single-pass fused hardswish + EMA + qparams + fake quant, for
# activations whose output slab fits in VMEM.  The output block is resident
# (constant block index); tiles of 6*hardswish(x) are stashed into it while
# the global min/max accumulates, and at the last step the slab is
# fake-quantized in place.  HBM traffic = read x + write out, one launch.
# ---------------------------------------------------------------------------
def _fused_hswish_fq_kernel(ar_ref, x_ref, o_ref, rng_ref, mn_sc, mx_sc,
                            *, q_max, smooth, n_blocks):
    j = pl.program_id(0)
    tf = x_ref.shape[1]
    xf = x_ref[...].astype(jnp.float32)
    y6 = _hswish6(xf)
    off = pl.multiple_of(j * tf, 128)
    o_ref[:, pl.ds(off, tf)] = y6.astype(o_ref.dtype)       # stash 6*hardswish

    @pl.when(j == 0)
    def _():
        mn_sc[...] = y6
        mx_sc[...] = y6

    @pl.when(j > 0)
    def _():
        mn_sc[...] = jnp.minimum(mn_sc[...], y6)
        mx_sc[...] = jnp.maximum(mx_sc[...], y6)

    @pl.when(j == n_blocks - 1)
    def _():
        qmaxf = jnp.float32(q_max)
        x_min = jnp.min(mn_sc[...], keepdims=True) * (1.0 / 6.0)    # (1, 1)
        x_max = jnp.max(mx_sc[...], keepdims=True) * (1.0 / 6.0)
        new_min = ar_ref[0] * smooth + x_min * (1.0 - smooth)
        new_max = ar_ref[1] * smooth + x_max * (1.0 - smooth)
        rng_ref[0] = jnp.broadcast_to(new_min, (8, 128))
        rng_ref[1] = jnp.broadcast_to(new_max, (8, 128))
        # calc_qparams: s = range / q_max, z = clip(-round(min/s), 0, q_max).
        # NOTE: s is clamped to 1e-8 to guard a degenerate (min == max) range;
        # PyTorch's calc_qparams would divide by zero in that case.
        s = jnp.maximum((new_max - new_min) / qmaxf, 1e-8)
        z = jnp.clip(-jnp.round(new_min / s), 0.0, qmaxf)
        inv_6s = 1.0 / (6.0 * s)

        def body(t, carry):
            o2 = pl.multiple_of(t * tf, 128)
            blk = o_ref[:, pl.ds(o2, tf)].astype(jnp.float32)
            q = jnp.clip(jnp.round(blk * inv_6s + z), 0.0, qmaxf)
            o_ref[:, pl.ds(o2, tf)] = ((q - z) * s).astype(o_ref.dtype)
            return carry

        lax.fori_loop(0, n_blocks, body, 0)


def fused_hswish_fq(x2d, act_range, *, q_max, smooth, tf, nb, vmem_limit):
    m8, ftot = x2d.shape
    kern = functools.partial(_fused_hswish_fq_kernel, q_max=q_max, smooth=smooth,
                             n_blocks=nb)
    out, rng = pl.pallas_call(
        kern,
        out_shape=(jax.ShapeDtypeStruct((m8, ftot), x2d.dtype),
                   jax.ShapeDtypeStruct((2, 8, 128), jnp.float32)),
        grid=(nb,),
        in_specs=[pl.BlockSpec(memory_space=pltpu.MemorySpace.SMEM),   # (2,) act_range
                  pl.BlockSpec((8, tf), lambda j: (0, j))],
        out_specs=(pl.BlockSpec((8, ftot), lambda j: (0, 0)),          # resident slab
                   pl.BlockSpec((2, 8, 128), lambda j: (0, 0, 0))),
        scratch_shapes=[pltpu.VMEM((8, tf), jnp.float32),
                        pltpu.VMEM((8, tf), jnp.float32)],
        compiler_params=pltpu.CompilerParams(
            dimension_semantics=("arbitrary",),
            vmem_limit_bytes=vmem_limit),
    )(act_range, x2d)
    return out, rng[:, 0, 0]


# ---------------------------------------------------------------------------
# Forward, mirroring QActivation.forward.  Module state (act_range, apply_ema)
# is passed in and returned (no in-place nn.Parameter mutation in JAX).
# Hardswish / min-max run in f32 even for lower-precision inputs.
# ---------------------------------------------------------------------------
def q_activation_forward(
    x,                     # (B, C, H, W)
    act_range,             # (2,) float32 device array: (min, max) state
    apply_ema,             # python bool state
    *,
    smooth=0.995,
    bit=4,
    apply_fake_quantization=True,
    use_ste=False,
    training=True,
):
    q_max = 2 ** bit - 1
    cfg = _tpu_config()
    orig_shape = x.shape
    n = x.size
    x2d, tf, nb = _prep(x, cfg["tf_cap"])

    def unflatten(o2d):
        return o2d.reshape(-1)[:n].reshape(orig_shape)

    if not training:
        out2d = hswish_only(x2d, tf=tf, nb=nb, vmem_limit=cfg["vmem_limit"])
        return unflatten(out2d), act_range, apply_ema

    act_range = jnp.asarray(act_range, jnp.float32)
    inv6 = 1.0 / 6.0

    if apply_ema:
        if apply_fake_quantization:
            if n * 4 <= cfg["single_pass_max"]:
                # Single launch: hardswish + global min/max + EMA + qparams + FQ.
                out2d, new_act_range = fused_hswish_fq(
                    x2d, act_range, q_max=q_max, smooth=smooth, tf=tf, nb=nb,
                    vmem_limit=cfg["vmem_limit"])
            else:
                # Large activations: 2-pass, no y HBM round-trip (3x traffic).
                mn, mx = hswish_minmax(x2d, tf=tf, nb=nb,
                                       vmem_limit=cfg["vmem_limit"])
                x_min = jnp.min(mn) * inv6
                x_max = jnp.max(mx) * inv6
                new_min = act_range[0] * smooth + x_min * (1.0 - smooth)
                new_max = act_range[1] * smooth + x_max * (1.0 - smooth)
                new_act_range = jnp.stack([new_min, new_max]).astype(jnp.float32)
                s = jnp.maximum((new_max - new_min) / q_max, 1e-8)
                z = jnp.clip(-jnp.round(new_min / s), 0.0, float(q_max))
                qparams = jnp.stack([s, 1.0 / (6.0 * s), z]).astype(jnp.float32)
                out2d = hswish_fake_quant(x2d, qparams, q_max=q_max, tf=tf, nb=nb,
                                          vmem_limit=cfg["vmem_limit"])
        else:
            out2d, mn, mx = hswish_with_range(x2d, tf=tf, nb=nb,
                                              vmem_limit=cfg["vmem_limit"])
            new_min = act_range[0] * smooth + jnp.min(mn) * inv6 * (1.0 - smooth)
            new_max = act_range[1] * smooth + jnp.max(mx) * inv6 * (1.0 - smooth)
            new_act_range = jnp.stack([new_min, new_max]).astype(jnp.float32)
        new_apply_ema = apply_ema
    else:
        out2d, mn, mx = hswish_with_range(x2d, tf=tf, nb=nb,
                                          vmem_limit=cfg["vmem_limit"])
        new_act_range = (jnp.stack([jnp.min(mn), jnp.max(mx)]) * inv6).astype(jnp.float32)
        new_apply_ema = True

    # TODO(synk): use_ste only alters the backward pass (straight-through gradient);
    # forward values are identical, so only the forward is implemented here.
    del use_ste
    return unflatten(out2d), new_act_range, new_apply_ema


# ---------------------------------------------------------------------------
if __name__ == "__main__":
    key = jax.random.PRNGKey(0)
    B, C, H, W = 2, 4, 16, 16
    bit = 4
    x = jax.random.normal(key, (B, C, H, W), dtype=jnp.float32) * 3.0

    xnp = np.asarray(x)
    ref = xnp * np.clip(xnp + 3.0, 0.0, 6.0) * (1.0 / 6.0)   # hardswish reference

    act_range = jnp.zeros((2,), dtype=jnp.float32)
    apply_ema = False

    # Step 1: init path (apply_ema False) -> out = hardswish(x), act_range initialized.
    out1, act_range, apply_ema = q_activation_forward(
        x, act_range, apply_ema,
        smooth=0.995, bit=bit, apply_fake_quantization=True, use_ste=False, training=True)
    out1 = jax.block_until_ready(out1)
    assert np.allclose(np.asarray(out1), ref, atol=1e-5)
    assert bool(apply_ema)
    ar = np.asarray(act_range)
    assert np.allclose(ar, [ref.min(), ref.max()], atol=1e-5)

    # Step 2: EMA + fake-quantization path (single-pass fused kernel at this size).
    out2, act_range, apply_ema = q_activation_forward(
        x, act_range, apply_ema,
        smooth=0.995, bit=bit, apply_fake_quantization=True, use_ste=False, training=True)
    out2 = jax.block_until_ready(out2)
    o2 = np.asarray(out2)
    assert o2.shape == (B, C, H, W)
    assert np.isfinite(o2).all()
    # fake-quantized output can take at most q_max + 1 distinct levels
    assert np.unique(np.round(o2, 5)).size <= (2 ** bit - 1) + 1

    # Step 3: eval path -> plain hardswish.
    out3, _, _ = q_activation_forward(
        x, act_range, apply_ema,
        smooth=0.995, bit=bit, apply_fake_quantization=True, use_ste=False, training=False)
    out3 = jax.block_until_ready(out3)
    assert np.allclose(np.asarray(out3), ref, atol=1e-5)

    print("KERNEL_OK")
</pallas_src>

<mosaic_0001>
module attributes {stable_mosaic.version = 11 : i64} {
  func.func @_hswish_out_minmax_kernel(%arg0: i32, %arg1: i32, %arg2: memref<8x128xf32, #tpu.memory_space<vmem>>, %arg3: memref<8x128xf32, #tpu.memory_space<vmem>>, %arg4: memref<1x8x128xf32, #tpu.memory_space<vmem>>, %arg5: memref<1x8x128xf32, #tpu.memory_space<vmem>>, %arg6: memref<8x128xf32, #tpu.memory_space<vmem>>, %arg7: memref<8x128xf32, #tpu.memory_space<vmem>>) attributes {dimension_semantics = [#tpu.dimension_semantics<parallel>, #tpu.dimension_semantics<arbitrary>], iteration_bounds = array<i64: 1, 2>, scalar_prefetch = 0 : i64, scratch_operands = 2 : i64, tpu.core_type = #tpu.core_type<tc>, window_params = [{transform_indices = @transform_0, window_bounds = array<i64: 8, 128>}, {transform_indices = @transform_1, window_bounds = array<i64: 8, 128>}, {transform_indices = @transform_2, window_bounds = array<i64: 1, 8, 128>}, {transform_indices = @transform_3, window_bounds = array<i64: 1, 8, 128>}]} {
    %c0 = arith.constant 0 : index
    %c0_0 = arith.constant 0 : index
    %0 = vector.load %arg2[%c0, %c0_0] : memref<8x128xf32, #tpu.memory_space<vmem>>, vector<8x128xf32>
    %cst = arith.constant 3.000000e+00 : f32
    %1 = vector.broadcast %cst : f32 to vector<8x128xf32>
    %2 = arith.addf %0, %1 : vector<8x128xf32>
    %cst_1 = arith.constant 0.000000e+00 : f32
    %cst_2 = arith.constant 6.000000e+00 : f32
    %3 = vector.broadcast %cst_1 : f32 to vector<8x128xf32>
    %4 = arith.maximumf %3, %2 : vector<8x128xf32>
    %5 = vector.broadcast %cst_2 : f32 to vector<8x128xf32>
    %6 = arith.minimumf %5, %4 : vector<8x128xf32>
    %7 = arith.mulf %0, %6 : vector<8x128xf32>
    %cst_3 = arith.constant 0.166666672 : f32
    %8 = vector.broadcast %cst_3 : f32 to vector<8x128xf32>
    %9 = arith.mulf %7, %8 : vector<8x128xf32>
    %c0_4 = arith.constant 0 : index
    %c0_5 = arith.constant 0 : index
    %10 = vector.load %arg3[%c0_4, %c0_5] : memref<8x128xf32, #tpu.memory_space<vmem>>, vector<8x128xf32>
    tpu.vector_store %arg3[%c0_4, %c0_5], %9 {strides = array<i32>} : memref<8x128xf32, #tpu.memory_space<vmem>>, vector<8x128xf32>,
    %c0_i32 = arith.constant 0 : i32
    %11 = arith.cmpi eq, %arg1, %c0_i32 : i32
    %12 = arith.extui %11 : i1 to i32
    %c0_i32_6 = arith.constant 0 : i32
    %13 = arith.cmpi ne, %12, %c0_i32_6 : i32
    scf.if %13 {
      %c0_10 = arith.constant 0 : index
      %c0_11 = arith.constant 0 : index
      %20 = vector.load %arg6[%c0_10, %c0_11] : memref<8x128xf32, #tpu.memory_space<vmem>>, vector<8x128xf32>
      tpu.vector_store %arg6[%c0_10, %c0_11], %7 {strides = array<i32>} : memref<8x128xf32, #tpu.memory_space<vmem>>, vector<8x128xf32>,
      %c0_12 = arith.constant 0 : index
      %c0_13 = arith.constant 0 : index
      %21 = vector.load %arg7[%c0_12, %c0_13] : memref<8x128xf32, #tpu.memory_space<vmem>>, vector<8x128xf32>
      tpu.vector_store %arg7[%c0_12, %c0_13], %7 {strides = array<i32>} : memref<8x128xf32, #tpu.memory_space<vmem>>, vector<8x128xf32>,
    } else {
    }
    %c0_i32_7 = arith.constant 0 : i32
    %14 = arith.cmpi sgt, %arg1, %c0_i32_7 : i32
    %15 = arith.extui %14 : i1 to i32
    %c0_i32_8 = arith.constant 0 : i32
    %16 = arith.cmpi ne, %15, %c0_i32_8 : i32
    scf.if %16 {
      %c0_10 = arith.constant 0 : index
      %c0_11 = arith.constant 0 : index
      %20 = vector.load %arg6[%c0_10, %c0_11] : memref<8x128xf32, #tpu.memory_space<vmem>>, vector<8x128xf32>
      %21 = arith.minimumf %20, %7 : vector<8x128xf32>
      %c0_12 = arith.constant 0 : index
      %c0_13 = arith.constant 0 : index
      %22 = vector.load %arg6[%c0_12, %c0_13] : memref<8x128xf32, #tpu.memory_space<vmem>>, vector<8x128xf32>
      tpu.vector_store %arg6[%c0_12, %c0_13], %21 {strides = array<i32>} : memref<8x128xf32, #tpu.memory_space<vmem>>, vector<8x128xf32>,
      %c0_14 = arith.constant 0 : index
      %c0_15 = arith.constant 0 : index
      %23 = vector.load %arg7[%c0_14, %c0_15] : memref<8x128xf32, #tpu.memory_space<vmem>>, vector<8x128xf32>
      %24 = arith.maximumf %23, %7 : vector<8x128xf32>
      %c0_16 = arith.constant 0 : index
      %c0_17 = arith.constant 0 : index
      %25 = vector.load %arg7[%c0_16, %c0_17] : memref<8x128xf32, #tpu.memory_space<vmem>>, vector<8x128xf32>
      tpu.vector_store %arg7[%c0_16, %c0_17], %24 {strides = array<i32>} : memref<8x128xf32, #tpu.memory_space<vmem>>, vector<8x128xf32>,
    } else {
    }
    %c1_i32 = arith.constant 1 : i32
    %17 = arith.cmpi eq, %arg1, %c1_i32 : i32
    %18 = arith.extui %17 : i1 to i32
    %c0_i32_9 = arith.constant 0 : i32
    %19 = arith.cmpi ne, %18, %c0_i32_9 : i32
    scf.if %19 {
      %c0_10 = arith.constant 0 : index
      %c0_11 = arith.constant 0 : index
      %20 = vector.load %arg6[%c0_10, %c0_11] : memref<8x128xf32, #tpu.memory_space<vmem>>, vector<8x128xf32>
      %21 = vector.shape_cast %20 : vector<8x128xf32> to vector<1x8x128xf32>
      %cst_12 = arith.constant dense<0x7F800000> : vector<1xf32>
      %22 = vector.multi_reduction <minimumf>, %21, %cst_12 [1, 2] : vector<1x8x128xf32> to vector<1xf32>
      %23 = vector.shape_cast %22 : vector<1xf32> to vector<1x1x1xf32>
      %24 = vector.extract %23[0, 0, 0] : f32 from vector<1x1x1xf32>
      %25 = vector.broadcast %24 : f32 to vector<1x1xf32>
      %26 = vector.shape_cast %25 : vector<1x1xf32> to vector<1x1xf32>
      %27 = vector.broadcast %26 : vector<1x1xf32> to vector<8x128xf32>
      %c0_13 = arith.constant 0 : index
      %c0_14 = arith.constant 0 : index
      %c0_15 = arith.constant 0 : index
      %28 = vector.load %arg4[%c0_13, %c0_14, %c0_15] : memref<1x8x128xf32, #tpu.memory_space<vmem>>, vector<1x8x128xf32>
      %29 = vector.shape_cast %28 : vector<1x8x128xf32> to vector<8x128xf32>
      %30 = vector.shape_cast %27 : vector<8x128xf32> to vector<1x8x128xf32>
      tpu.vector_store %arg4[%c0_13, %c0_14, %c0_15], %30 {strides = array<i32>} : memref<1x8x128xf32, #tpu.memory_space<vmem>>, vector<1x8x128xf32>,
      %c0_16 = arith.constant 0 : index
      %c0_17 = arith.constant 0 : index
      %31 = vector.load %arg7[%c0_16, %c0_17] : memref<8x128xf32, #tpu.memory_space<vmem>>, vector<8x128xf32>
      %32 = vector.shape_cast %31 : vector<8x128xf32> to vector<1x8x128xf32>
      %cst_18 = arith.constant dense<0xFF800000> : vector<1xf32>
      %33 = vector.multi_reduction <maximumf>, %32, %cst_18 [1, 2] : vector<1x8x128xf32> to vector<1xf32>
      %34 = vector.shape_cast %33 : vector<1xf32> to vector<1x1x1xf32>
      %35 = vector.extract %34[0, 0, 0] : f32 from vector<1x1x1xf32>
      %36 = vector.broadcast %35 : f32 to vector<1x1xf32>
      %37 = vector.shape_cast %36 : vector<1x1xf32> to vector<1x1xf32>
      %38 = vector.broadcast %37 : vector<1x1xf32> to vector<8x128xf32>
      %c0_19 = arith.constant 0 : index
      %c0_20 = arith.constant 0 : index
      %c0_21 = arith.constant 0 : index
      %39 = vector.load %arg5[%c0_19, %c0_20, %c0_21] : memref<1x8x128xf32, #tpu.memory_space<vmem>>, vector<1x8x128xf32>
      %40 = vector.shape_cast %39 : vector<1x8x128xf32> to vector<8x128xf32>
      %41 = vector.shape_cast %38 : vector<8x128xf32> to vector<1x8x128xf32>
      tpu.vector_store %arg5[%c0_19, %c0_20, %c0_21], %41 {strides = array<i32>} : memref<1x8x128xf32, #tpu.memory_space<vmem>>, vector<1x8x128xf32>,
    } else {
    }
    return
  }
  func.func @transform_0(%arg0: i32, %arg1: i32) -> (i32, i32) {
    %c2_i32 = arith.constant 2 : i32
    %0 = arith.muli %arg0, %c2_i32 : i32
    %1 = arith.addi %0, %arg1 : i32
    %c0_i32 = arith.constant 0 : i32
    %c0_i32_0 = arith.constant 0 : i32
    return %c0_i32, %1 : i32, i32
  }
  func.func @transform_1(%arg0: i32, %arg1: i32) -> (i32, i32) {
    %c2_i32 = arith.constant 2 : i32
    %0 = arith.muli %arg0, %c2_i32 : i32
    %1 = arith.addi %0, %arg1 : i32
    %c0_i32 = arith.constant 0 : i32
    %c0_i32_0 = arith.constant 0 : i32
    return %c0_i32, %1 : i32, i32
  }
  func.func @transform_2(%arg0: i32, %arg1: i32) -> (i32, i32, i32) {
    %c0_i32 = arith.constant 0 : i32
    %c0_i32_0 = arith.constant 0 : i32
    %c0_i32_1 = arith.constant 0 : i32
    return %arg0, %c0_i32, %c0_i32_0 : i32, i32, i32
  }
  func.func @transform_3(%arg0: i32, %arg1: i32) -> (i32, i32, i32) {
    %c0_i32 = arith.constant 0 : i32
    %c0_i32_0 = arith.constant 0 : i32
    %c0_i32_1 = arith.constant 0 : i32
    return %arg0, %c0_i32, %c0_i32_0 : i32, i32, i32
  }
}

</mosaic_0001>

<bundles_post_ra>
// kernel: tpu_custom_call.1
= control target key start
LH: loop header
LB: loop body
LE: loop exit
PB: predicated region body
PF: predicated region fallthrough
CT: control target
= control target key end

     0   :  { %9 = vsyncpa [#allocation5], 0  ;;  %s869_s0 = inlined_call_operand.hbm [shape: f32[8,256], index: 0, kind: input, shape index: {}]   ;;  %s870_s1 = inlined_call_operand.hbm [shape: f32[8,256], index: 1, kind: output, shape index: {0}]   ;;  %s871_s2 = inlined_call_operand.hbm [shape: f32[1,8,128], index: 2, kind: output, shape index: {1}]   ;;  %s872_s3 = inlined_call_operand.hbm [shape: f32[1,8,128], index: 3, kind: output, shape index: {2}]  }
   0x1   :  { %11 = vsyncpa [#allocation5 + $0x1], 0 }
   0x2   :  { %12 = vsyncpa [#allocation6], 0 }
   0x3   :  { %14 = vsyncpa [#allocation6 + $0x1], 0 }
   0x4   :  { %15 = vsyncpa [#allocation9], 0  ;;  %s704_s12 = smov 0   ;;  %s706_s13 = smov 0  }
   0x5   :  { %s708_s14 = smov 0   ;;  %s710_s15 = smov 0  }
   0x6   :  { %s712_s16 = smov 0   ;;  %s714_s17 = smov 0  }
   0x7 LB: > { %s418_s18 = sadd.s32 4294967295, %s678_s17   ;;  %s419_s19 = sadd.s32 4294967294, %s678_s17   ;;  %s678_s17 = sphi %s714_s17, %s21_s17   ;;  %s674_s16 = sphi %s712_s16, %s887_s16   ;;  %s670_s15 = sphi %s710_s15, %s886_s15   ;;  %s666_s14 = sphi %s708_s14, %s885_s14   ;;  %s662_s13 = sphi %s706_s13, %s884_s13   ;;  %s658_s12 = sphi %s704_s12, %s883_s12  }
   0x8   : > { %s30_s20 = sadd.s32 1, %s674_s16  ;;  %s44_s21 = sadd.s32 1, %s666_s14 }
   0x9   : > { %p31_p0 = scmp.ge.s32.totalorder %s30_s20, 2  ;;  %p51_p1 = scmp.ne.s32.totalorder %s666_s14, %s662_s13 }
   0xa   : > { %p52_p2 = scmp.eq.s32.totalorder %s678_s17, 0  ;;  %p57_p3 = scmp.ne.s32.totalorder %s662_s13, %s658_s12 }
   0xb   : > { %s889_s20 = smov (%p31_p0, %s30_s20), 0  ;;  %p58_p5 = scmp.eq.s32.totalorder %s418_s18, 0 }
   0xc   : > { %p745_p4 = por %p52_p2, %p51_p1  ;;  %s41_s23 = ssub.s32 %s674_s16, %s889_s20 }
   0xd   : > { %p751_p6 = scmp.eq.s32.totalorder %s418_s18, 1  ;;  %p42_p7 = scmp.eq.s32.totalorder %s41_s23, 0 }
   0xe   : > { %p755_p8 = por %p58_p5, %p57_p3  ;;  %p91_p10 = scmp.eq.s32.totalorder %s419_s19, 1 }
   0xf   : > { %p761_p9 = por %p751_p6, %p51_p1  ;;  %p462_p13 = scmp.lt.s32.totalorder %s678_s17, 2 }
  0x10   : > { %s766_s27 = scalar_select %p42_p7, %s666_s14, %s44_s21  }
  0x11   : > { %s877_s26 = scalar_select %p761_p9, 1, 0 }
  0x12   : > { %p768_p11 = por %p91_p10, %p57_p3  ;;  %s163_s29 = sand.u32 1, %s666_s14  }
  0x13   : > { %s422_s30 = sshll.u32 %s163_s29, 3  ;;  %s423_s4 = sshll.u32 %s674_s16, 7 }
  0x14   : > { %s878_s28 = scalar_select %p768_p11, 1, 0 }
  0x15   : > { %s174_s7 = scalar_lea.hbm %s869_s0, %s423_s4  ;;  %s167_s8 = scalar_lea.vmem [#allocation4], %s422_s30 }
  0x16   : > { %s176_s9 = sshll.u32 %s167_s8, 4  ;;  %p781_p0 = pnand %p462_p13, %p745_p4  ;;  %s177_s9 = int_to_ptr.vmem [resolvable:$true] %s176_s9 }
  0x17   : > { %p424_p1 = scmp.ge.s32.totalorder %s678_s17, 1  ;;  %p181_p2 = scmp.lt.s32.totalorder %s678_s17, 3 }
  0x18   : > { %s164_s11 = scalar_lea.sflag [#allocation5], %s163_s29  ;;  %p520_p3 = pneg %p781_p0 }
  0x19   : > { %s531_s18 = scalar_lea.vmem %s177_s9, 128  ;;  %s680_s19 = smov [#allocation4]  }
  0x1a   : > { %p532_p5 = scmp.ne.s32.totalorder %s177_s9, %s531_s18  ;;  %s536_s21 = sshll.u32 %s680_s19, 4  ;;  %s537_s21 = int_to_ptr.vmem [resolvable:$false] %s536_s21 }
  0x1b   : > { %s538_s23 = scalar_lea.vmem %s537_s21, 256  ;;  %p539_p12 = scmp.lt.s32.totalorder %s177_s9, %s537_s21 }
  0x1c   : > { %p534_p7 = pnand %p532_p5, %p520_p3  ;;  %p540_p11 = scmp.lt.s32.totalorder %s538_s23, %s531_s18 }
  0x1e   : > { %p535_p10 = pneg %p534_p7  ;;  %p541_p4 = por %p540_p11, %p539_p12 }
  0x20   : > { %p542_p13 = pnand %p541_p4, %p535_p10 }
  0x22   : > { %545 = shalt.err (!%p542_p13)
}
  0x23   : > { %457 = dma.hbm_to_vmem [thread:$0]  (!%p781_p0), %s174_s7, 128, %s177_s9, %s164_s11  }
  0x24   : > { %p182_p9 = pnand %p424_p1, %p181_p2 }
  0x25   : > { %s796_s22 = sand.u32 (!%p182_p9), 1, %s662_s13  }
  0x26   : > { %185 = sbr.rel (%p182_p9) target bundleno = 334 (0x14e), region = 24  ;;  %s425_s29 = sshll.u32 (!%p182_p9), %s796_s22, 3 }
  0x27   : > { %s188_s30 = scalar_lea.sflag (!%p182_p9), [#allocation5], %s796_s22  ;;  %s191_s4 = scalar_lea.vmem (!%p182_p9), [#allocation4], %s425_s29 }
  0x2b   : > { %645 = dma.done.wait (%p755_p8), %s188_s30, 128  }
  0x2c   : > { %647 = vsyncadd (%p755_p8), %s188_s30, 4294967168  ;;  %v218_v0 = vld [vmem:[%s191_s4] sm:$0xff]  ;;  %s804_s5 = scalar_lea.vmem [#allocation7], %s425_s29  ;;  %p427_p9 = scmp.ne.s32.totalorder %s670_s15, 0 }
  0x2d   : > { %v219_v1 = vadd.f32 3.0, %v218_v0 }
  0x2f   : > { %v220_v2 = vmax.f32 %v219_v1, 0.0 }
  0x31   : > { %v221_v3 = vmin.f32 %v220_v2, 6.0 }
  0x33   : > { %v222_v4 = vmul.f32 %v221_v3, %v218_v0  ;;  %228 = sbr.rel (%p427_p9) target bundleno = 57 (0x39), region = 32 }
  0x35   : > { %v223_v5 = vmul.f32 0.16666667, %v222_v4 }
  0x37   : > { %224 = vst [vmem:[%s804_s5] sm:$0xff] %v223_v5 }
  0x38   : > { %229 = vst [vmem:[#allocation2] sm:$0xff] %v222_v4  ;;  %230 = vst [vmem:[#allocation3] sm:$0xff] %v222_v4 }
  0x39 PF: > { %p428_p11 = scmp.le.s32.totalorder %s670_s15, 0 }
  0x3b   : > { %234 = sbr.rel (%p428_p11) target bundleno = 68 (0x44), region = 36 }
  0x40   : > { %v235_v6 = vld [vmem:[#allocation2] sm:$0xff]  ;;  %v238_v7 = vld [vmem:[#allocation3] sm:$0xff] }
  0x41   : > { %v236_v8 = vmin.f32 %v235_v6, %v222_v4  ;;  %v239_v9 = vmax.f32 %v238_v7, %v222_v4 }
  0x43   : > { %237 = vst [vmem:[#allocation2] sm:$0xff] %v236_v8  ;;  %240 = vst [vmem:[#allocation3] sm:$0xff] %v239_v9 }
  0x44 PF: > { %p429_p8 = scmp.ne.s32.totalorder %s670_s15, 1 }
  0x46   : > { %244 = sbr.rel (%p429_p8) target bundleno = 282 (0x11a), region = 40 }
  0x4b   : > { %v245_v10 = vld [vmem:[#allocation2] sm:$0xff]  ;;  %v257_v11 = vld [vmem:[#allocation3] sm:$0xff] }
  0x4c   : > { %246 = vmin.xlane.f32.xlu0 %v245_v10 }
  0x50   : > { %258 = vmax.xlane.f32.xlu0 %v257_v11 }
  0xd5   : > { %v247_v12 = vpop.xlane.xlu0 %246 }
  0xd6   : > { %v248_v13 = vrot.slane %v247_v12, 4 }
  0xd8   : > { %v249_v14 = vmin.f32 %v247_v12, %v248_v13 }
  0xd9   : > { %v259_v15 = vpop.xlane.xlu0 %258 }
  0xda   : > { %v250_v16 = vrot.slane %v249_v14, 2  ;;  %v260_v17 = vrot.slane %v259_v15, 4 }
  0xdc   : > { %v261_v18 = vmax.f32 %v259_v15, %v260_v17  ;;  %v251_v19 = vmin.f32 %v249_v14, %v250_v16 }
  0xde   : > { %v262_v20 = vrot.slane %v261_v18, 2  ;;  %v252_v21 = vrot.slane %v251_v19, 1 }
  0xe0   : > { %v263_v22 = vmax.f32 %v261_v18, %v262_v20  ;;  %v253_v23 = vmin.f32 %v251_v19, %v252_v21 }
  0xe2   : > { %438 = vpush %v253_v23  ;;  %v264_v24 = vrot.slane %v263_v22, 1 }
  0xe4   : > { %v265_v25 = vmax.f32 %v263_v22, %v264_v24 }
  0xe6   : > { %440 = vpush %v265_v25 }
 0x113   : > { %s439_s25 = spop %438 }
 0x114   : > { %v255_v26 = vstv %s439_s25 }
 0x115   : > { %256 = vst [vmem:[#allocation8] sm:$0xff] %v255_v26 }
 0x117   : > { %s441_s6 = spop %440 }
 0x118   : > { %v267_v27 = vstv %s441_s6 }
 0x119   : > { %268 = vst [vmem:[#allocation10] sm:$0xff] %v267_v27 }
 0x11a PF: > { %s681_s7 = smov [#allocation8]   ;;  %s431_s9 = sshll.u32 %s670_s15, 7 }
 0x11b   : > { %s298_s8 = sshll.u32 %s681_s7, 4  ;;  %s299_s8 = int_to_ptr.vmem [resolvable:$true] %s298_s8 }
 0x11c   : > { %s546_s10 = scalar_lea.vmem %s299_s8, 128  ;;  %p553_p2 = scmp.lt.s32.totalorder %s299_s8, %s299_s8 }
 0x11d   : > { %p547_p12 = scmp.ne.s32.totalorder %s299_s8, %s546_s10  ;;  %p554_p3 = scmp.lt.s32.totalorder %s546_s10, %s546_s10 }
 0x11f   : > { %p548_p0 = pnand %p547_p12, %p751_p6  ;;  %p555_p5 = por %p554_p3, %p553_p2 }
 0x121   : > { %p549_p1 = pneg %p548_p0 }
 0x123   : > { %p556_p7 = pnand %p555_p5, %p549_p1 }
 0x125   : > { %559 = shalt.err (!%p556_p7)
}
 0x126   : > { %446 = dma.vmem_to_hbm [thread:$0]  (%p751_p6), %s299_s8, 128, %s871_s2, [#allocation9]  }
 0x127   : > { %s283_s21 = scalar_lea.hbm %s870_s1, %s431_s9  ;;  %s285_s23 = sshll.u32 %s804_s5, 4  ;;  %s286_s23 = int_to_ptr.vmem [resolvable:$true] %s285_s23 }
 0x128   : > { %s270_s29 = scalar_lea.sflag [#allocation6], %s796_s22  ;;  %s570_s30 = scalar_lea.vmem %s286_s23, 128 }
 0x129   : > { %p571_p10 = scmp.ne.s32.totalorder %s286_s23, %s570_s30  ;;  %p880_p4 = scmp.ne.s32.totalorder %s877_s26, 0 }
 0x12a   : > { %s682_s4 = smov [#allocation7]  }
 0x12b   : > { %p572_p13 = pnand %p571_p10, %p880_p4  ;;  %s574_s25 = sshll.u32 %s682_s4, 4  ;;  %s575_s25 = int_to_ptr.vmem [resolvable:$false] %s574_s25 }
 0x12c   : > { %s576_s6 = scalar_lea.vmem %s575_s25, 256  ;;  %p577_p11 = scmp.lt.s32.totalorder %s286_s23, %s575_s25 }
 0x12d   : > { %p573_p9 = pneg %p572_p13  ;;  %p578_p8 = scmp.lt.s32.totalorder %s576_s6, %s570_s30 }
 0x12f   : > { %p579_p12 = por %p578_p8, %p577_p11 }
 0x131   : > { %p580_p0 = pnand %p579_p12, %p573_p9 }
 0x133   : > { %583 = shalt.err (!%p580_p0)
}
 0x134   : > { %s584_s7 = scalar_lea.hbm %s283_s21, 128  ;;  %s588_s8 = scalar_lea.hbm %s870_s1, 256 }
 0x135   : > { %p585_p1 = scmp.ne.s32.totalorder %s283_s21, %s584_s7  ;;  %p589_p5 = scmp.lt.s32.totalorder %s283_s21, %s870_s1 }
 0x136   : > { %p590_p7 = scmp.lt.s32.totalorder %s588_s8, %s584_s7 }
 0x137   : > { %p586_p2 = pnand %p585_p1, %p880_p4 }
 0x138   : > { %p591_p10 = por %p590_p7, %p589_p5 }
 0x139   : > { %p587_p3 = pneg %p586_p2 }
 0x13b   : > { %p592_p13 = pnand %p591_p10, %p587_p3 }
 0x13d   : > { %595 = shalt.err (!%p592_p13)
}
 0x13e   : > { %444 = dma.vmem_to_hbm [thread:$0]  (%p880_p4), %s286_s23, 128, %s283_s21, %s270_s29  }
 0x13f   : > { %s683_s11 = smov [#allocation10]  }
 0x140   : > { %s311_s18 = sshll.u32 %s683_s11, 4  ;;  %s312_s18 = int_to_ptr.vmem [resolvable:$true] %s311_s18 }
 0x141   : > { %s596_s15 = scalar_lea.vmem %s312_s18, 128  ;;  %p603_p12 = scmp.lt.s32.totalorder %s312_s18, %s312_s18 }
 0x142   : > { %p597_p9 = scmp.ne.s32.totalorder %s312_s18, %s596_s15  ;;  %p604_p0 = scmp.lt.s32.totalorder %s596_s15, %s596_s15 }
 0x144   : > { %p598_p11 = pnand %p597_p9, %p751_p6  ;;  %p605_p1 = por %p604_p0, %p603_p12 }
 0x146   : > { %p599_p8 = pneg %p598_p11 }
 0x148   : > { %p606_p2 = pnand %p605_p1, %p599_p8 }
 0x14a   : > { %609 = shalt.err (!%p606_p2)
}
 0x14b   : > { %448 = dma.vmem_to_hbm [thread:$0]  (%p751_p6), %s312_s18, 128, %s872_s3, [#allocation9]  }
 0x14c   : > { %649 = dma.done.wait (%p751_p6), [#allocation9], 256  }
 0x14d   : > { %651 = vsyncadd (%p751_p6), [#allocation9], 4294967040 }
 0x14e PF: > { %s331_s26 = sand.u32 1, %s658_s12   ;;  %p881_p4 = scmp.ne.s32.totalorder %s878_s28, 0 }
 0x14f   : > { %p882_p3 = scmp.ge.s32.totalorder %s678_s17, 2  ;;  %s332_s21 = scalar_lea.sflag [#allocation6], %s331_s26 }
 0x151   : > { %p459_p5 = pnand %p882_p3, %p881_p4 }
 0x153   : > { %p460_p7 = pneg %p459_p5 }
 0x155   : > { %653 = dma.done.wait (%p460_p7), %s332_s21, 128  }
 0x156   : > { %655 = vsyncadd (%p460_p7), %s332_s21, 4294967168  ;;  %s21_s17 = sadd.s32 1, %s678_s17   ;;  %s883_s12 = smov %s662_s13 }
 0x157   : > { %p18_p10 = scmp.ge.s32.totalorder %s21_s17, 4   ;;  %s884_s13 = smov %s666_s14 }
 0x158   : > { %s885_s14 = smov %s766_s27  ;;  %s886_s15 = smov %s674_s16 }
 0x159   : > { %s887_s16 = smov %s889_s20  ;;  %20 = sbr.rel (!%p18_p10) target bundleno = 7 (0x7), region = 99 }
 0x15e   :  { %337 = vsyncpa [#allocation5], 1 }
 0x15f   :  { %339 = vsyncpa [#allocation5 + $0x1], 1 }
 0x160   :  { %340 = vsyncpa [#allocation6], 1 }
 0x161   :  { %342 = vsyncpa [#allocation6 + $0x1], 1 }
 0x162   :  { %343 = vsyncpa [#allocation9], 1 }

</bundles_post_ra>
